<compile_context>
chip_gen: v7x
topology: tpu7x:2x2x1
jax: 0.10.0
libtpu: 0.0.40
codegen_flags: <defaults>
</compile_context>

<pallas_src>
import functools

import jax
import jax.numpy as jnp
from jax import lax
from jax.experimental import pallas as pl
from jax.experimental.pallas import tpu as pltpu


# ----------------------------------------------------------------------------
# helpers
# ----------------------------------------------------------------------------
def _ceil_to(x, m):
    return m * (-(-x // m))


def _pad_batch(x, rows):
    pad = rows - x.shape[0]
    if pad <= 0:
        return x
    widths = ((0, pad),) + ((0, 0),) * (x.ndim - 1)
    return jnp.pad(x, widths)


# ----------------------------------------------------------------------------
# Fused kernel: per batch block
#   1) gather TB last-token embedding rows from HBM (manual DMA, ids in SMEM)
#   2) letter-head matmul on the MXU (bf16 in, f32 accumulate)
#   3) (training) masked CE + distillation partial sums for this block
# ----------------------------------------------------------------------------
def _ranker_kernel(num_rows, tb, use_distillation, compute_loss, *refs):
    if compute_loss:
        (ids_ref, invt_ref, embed_hbm, w_ref, labels_ref, cem_ref, teach_ref,
         logits_ref, parts_ref, h_buf, sems) = refs
    else:
        (ids_ref, embed_hbm, w_ref, logits_ref, h_buf, sems) = refs

    base = pl.program_id(0) * tb

    # ---- fused gather: embed[last_token_id] rows, HBM -> VMEM scratch ----
    def row_copy(r):
        row = ids_ref[base + r]                       # SMEM scalar (prefetched)
        return pltpu.make_async_copy(embed_hbm.at[pl.ds(row, 1)],
                                     h_buf.at[pl.ds(r, 1)],
                                     sems.at[r])

    @pl.loop(0, tb)
    def _start(r):
        row_copy(r).start()

    @pl.loop(0, tb)
    def _wait(r):
        row_copy(r).wait()

    # ---- letter-head matmul (MXU), bf16 inputs / f32 accumulation ----
    h = h_buf[...].astype(w_ref.dtype)                          # (tb, H)
    logits = jnp.dot(h, w_ref[...],
                     preferred_element_type=jnp.float32)        # (tb, L) f32
    logits_ref[...] = logits

    if not compute_loss:
        return

    L = logits.shape[-1]
    row_ids = base + lax.broadcasted_iota(jnp.int32, (tb, 1), 0)
    row_valid = (row_ids < num_rows).astype(jnp.float32)        # (tb, 1)

    # log-softmax over the (unpadded) label axis, all in f32
    m = jnp.max(logits, axis=-1, keepdims=True)
    shifted = logits - m
    lse = jnp.log(jnp.sum(jnp.exp(shifted), axis=-1, keepdims=True))
    logp = shifted - lse                                        # (tb, L)

    # masked cross entropy partial sum (mean over B is applied outside)
    col_ids = lax.broadcasted_iota(jnp.int32, (tb, L), 1)
    onehot = (col_ids == labels_ref[...]).astype(jnp.float32)
    ce_per = -jnp.sum(onehot * logp, axis=-1, keepdims=True)    # (tb, 1)
    ce_part = jnp.sum(ce_per * cem_ref[...] * row_valid,
                      axis=0, keepdims=True)                    # (1, 1)

    if use_distillation:
        # softmax(teacher * (1/T)): scalar reciprocal broadcast, no tile divide
        t = teach_ref[...] * invt_ref[...]
        tm = jnp.max(t, axis=-1, keepdims=True)
        te = jnp.exp(t - tm)
        tsoft = te / jnp.sum(te, axis=-1, keepdims=True)
        per_row = jnp.sum(logp * tsoft, axis=-1, keepdims=True)  # (tb, 1)
        dist_part = -jnp.sum(per_row * row_valid, axis=0, keepdims=True)
    else:
        # teacher softmax statically skipped
        dist_part = jnp.zeros((1, 1), jnp.float32)

    # lane-dense per-block partial-sum tile: lane 0 = ce, lane 1 = dist
    lane = lax.broadcasted_iota(jnp.int32, (1, 8, 128), 2)
    parts_ref[...] = jnp.where(
        lane == 0, ce_part.reshape(1, 1, 1),
        jnp.where(lane == 1, dist_part.reshape(1, 1, 1), 0.0))


# ----------------------------------------------------------------------------
# wrapper: builds the grid / specs and calls the kernel
# ----------------------------------------------------------------------------
def _ranker_pallas(embed, w_letters, last_ids, *, loss_inputs=None,
                   use_distillation=True, tb=128):
    """loss_inputs: None (encode only) or (labels, ce_mask, teacher, temperature)."""
    V, H = embed.shape
    H2, L = w_letters.shape
    assert H == H2
    B = int(last_ids.shape[0])

    TB = _ceil_to(min(max(tb, 8), max(B, 1)), 8)     # sublane-aligned batch tile
    Bp = _ceil_to(max(B, 1), TB)
    nblk = Bp // TB

    ids_p = _pad_batch(last_ids.astype(jnp.int32).reshape(-1), Bp)

    embed_spec = pl.BlockSpec(memory_space=pl.ANY)                 # raw HBM ref
    w_spec = pl.BlockSpec((H, L), lambda i, ids: (0, 0))           # resident
    logits_spec = pl.BlockSpec((TB, L), lambda i, ids: (i, 0))
    scratch = [pltpu.VMEM((TB, H), jnp.float32),                   # gathered h
               pltpu.SemaphoreType.DMA((TB,))]

    w_bytes = H * L * jnp.dtype(w_letters.dtype).itemsize
    vmem_needed = (TB * H * 4 + 2 * w_bytes + 4 * TB * (L + 2) * 4
                   + 2 * 8 * 128 * 4 + (2 << 20))
    cparams = pltpu.CompilerParams(
        dimension_semantics=("parallel",),           # batch blocks independent
        vmem_limit_bytes=int(min(max(vmem_needed, 32 << 20), 64 << 20)))

    if loss_inputs is None:
        grid_spec = pltpu.PrefetchScalarGridSpec(
            num_scalar_prefetch=1, grid=(nblk,),
            in_specs=[embed_spec, w_spec],
            out_specs=logits_spec,
            scratch_shapes=scratch)
        logits_p = pl.pallas_call(
            functools.partial(_ranker_kernel, B, TB, False, False),
            out_shape=jax.ShapeDtypeStruct((Bp, L), jnp.float32),
            grid_spec=grid_spec,
            compiler_params=cparams,
        )(ids_p, embed, w_letters)
        return logits_p[:B]

    labels, ce_mask, teacher, temperature = loss_inputs
    labels_p = _pad_batch(labels.reshape(-1, 1).astype(jnp.int32), Bp)
    cem_p = _pad_batch(ce_mask.reshape(-1, 1).astype(jnp.float32), Bp)
    teach_p = _pad_batch(teacher.astype(jnp.float32).reshape(-1, L), Bp)
    if isinstance(temperature, (int, float)):
        inv_temp = jnp.full((1, 1), 1.0 / float(temperature), jnp.float32)
    else:
        inv_temp = (1.0 / jnp.asarray(temperature, jnp.float32)).reshape(1, 1)

    grid_spec = pltpu.PrefetchScalarGridSpec(
        num_scalar_prefetch=1, grid=(nblk,),
        in_specs=[
            pl.BlockSpec((1, 1), lambda i, ids: (0, 0)),        # 1/temperature
            embed_spec,                                         # embed (HBM)
            w_spec,                                             # letter head
            pl.BlockSpec((TB, 1), lambda i, ids: (i, 0)),       # labels
            pl.BlockSpec((TB, 1), lambda i, ids: (i, 0)),       # ce_mask
            pl.BlockSpec((TB, L), lambda i, ids: (i, 0)),       # teacher (no pad)
        ],
        out_specs=[
            logits_spec,
            pl.BlockSpec((1, 8, 128), lambda i, ids: (i, 0, 0)),  # partial sums
        ],
        scratch_shapes=scratch)

    logits_p, parts = pl.pallas_call(
        functools.partial(_ranker_kernel, B, TB, bool(use_distillation), True),
        out_shape=(jax.ShapeDtypeStruct((Bp, L), jnp.float32),
                   jax.ShapeDtypeStruct((nblk, 8, 128), jnp.float32)),
        grid_spec=grid_spec,
        compiler_params=cparams,
    )(ids_p, inv_temp, embed, w_letters, labels_p, cem_p, teach_p)

    inv_b = 1.0 / B                       # matches torch .mean() over batch
    ce = parts[:, 0, 0].sum() * inv_b
    dist = parts[:, 0, 1].sum() * inv_b
    return logits_p[:B], ce, dist


# ----------------------------------------------------------------------------
# EediRanker (synthetic base LM + Pallas kernels)
# ----------------------------------------------------------------------------
class EediRankerPallas:
    def __init__(self, vocab_size, hidden, num_labels, key,
                 matmul_dtype=jnp.bfloat16, tb=128):
        self.vocab_size = vocab_size
        self.hidden = hidden
        self.num_labels = num_labels
        self.tb = tb
        k1, k2 = jax.random.split(key)
        # TODO(synk): the real transformer stack (base causal LM) is replaced
        # by a synthetic last-token embedding lookup; attention_mask is unused.
        self.embed = (jax.random.normal(k1, (vocab_size, hidden), jnp.float32)
                      * 0.02)
        self.w_lm = (jax.random.normal(k2, (hidden, vocab_size), jnp.float32)
                     * 0.02)
        # synthetic tokenizer: letters 'A'.. -> fixed token ids
        self.tok_locations = jnp.arange(10, 10 + num_labels, dtype=jnp.int32)
        # Gather ONLY the letter columns of lm_head once at init and pre-cast
        # to the matmul dtype: no per-call pad / cast, no full-vocab matmul.
        self.w_letters = self.w_lm[:, self.tok_locations].astype(matmul_dtype)

    def encode(self, input_ids, attention_mask):
        del attention_mask
        return _ranker_pallas(self.embed, self.w_letters, input_ids[:, -1],
                              tb=self.tb)

    def forward(self, input_ids, attention_mask, labels=None,
                teacher_logits=None, ce_mask=None, temperature=1.0,
                use_distillation=True, **kwargs):
        del attention_mask, kwargs
        if labels is None:
            return dict(loss=None, logits=self.encode(input_ids, None),
                        distillation_loss=None, ce_loss=None)
        if use_distillation and teacher_logits is None:
            raise ValueError("Teacher logits are required for distillation loss")
        B = labels.shape[0]
        if ce_mask is None:
            ce_mask = jnp.ones((B,), jnp.float32)
        if teacher_logits is None:
            teacher_logits = jnp.zeros((B, self.num_labels), jnp.float32)
        logits, ce, dist = _ranker_pallas(
            self.embed, self.w_letters, input_ids[:, -1],
            loss_inputs=(labels, ce_mask, teacher_logits, temperature),
            use_distillation=use_distillation, tb=self.tb)
        if use_distillation:
            loss = 0.5 * ce + 0.5 * dist
        else:
            loss = ce
            dist = jnp.float32(0.0)
        return dict(loss=loss, logits=logits,
                    distillation_loss=dist, ce_loss=ce)


# ----------------------------------------------------------------------------
# pure-JAX loss reference (same semantics as the PyTorch module)
# ----------------------------------------------------------------------------
def _reference_losses(logits, labels, ce_mask, teacher_logits, temperature):
    logp = jax.nn.log_softmax(logits.astype(jnp.float32), axis=-1)
    ce_per = -jnp.take_along_axis(logp, labels[:, None], axis=-1)[:, 0]
    ce = jnp.mean(ce_per * ce_mask)
    tsoft = jax.nn.softmax(teacher_logits / temperature, axis=-1)
    dist = -jnp.mean(jnp.sum(logp * tsoft, axis=-1))
    return ce, dist


if __name__ == "__main__":
    B, S, H, V, L = 2, 8, 32, 256, 4
    key = jax.random.PRNGKey(0)
    k_model, k_ids, k_lab, k_teach = jax.random.split(key, 4)

    model = EediRankerPallas(vocab_size=V, hidden=H, num_labels=L, key=k_model)

    input_ids = jax.random.randint(k_ids, (B, S), 0, V, dtype=jnp.int32)
    attention_mask = jnp.ones((B, S), dtype=jnp.int32)
    labels = jax.random.randint(k_lab, (B,), 0, L, dtype=jnp.int32)
    ce_mask = jnp.ones((B,), dtype=jnp.float32)
    teacher_logits = jax.random.normal(k_teach, (B, L), jnp.float32)
    temperature = 2.0

    # --- distillation training path (fused kernel) ---
    out = model.forward(input_ids, attention_mask, labels=labels,
                        teacher_logits=teacher_logits, ce_mask=ce_mask,
                        temperature=temperature, use_distillation=True)
    jax.block_until_ready(out["loss"])
    jax.block_until_ready(out["logits"])

    # logits vs. a JAX reference that applies the same bf16 casts
    h_last = model.embed[input_ids[:, -1]]
    ref_logits = jnp.dot(h_last.astype(model.w_letters.dtype), model.w_letters,
                         preferred_element_type=jnp.float32)
    assert out["logits"].shape == (B, L)
    assert jnp.allclose(out["logits"], ref_logits, atol=1e-4, rtol=1e-4)

    # loss math vs. pure-JAX reference on the kernel's own logits (f32 math)
    ref_ce, ref_dist = _reference_losses(out["logits"], labels, ce_mask,
                                         teacher_logits, temperature)
    assert jnp.allclose(out["ce_loss"], ref_ce, atol=1e-5, rtol=1e-5)
    assert jnp.allclose(out["distillation_loss"], ref_dist, atol=1e-5, rtol=1e-5)
    assert jnp.allclose(out["loss"], 0.5 * ref_ce + 0.5 * ref_dist,
                        atol=1e-5, rtol=1e-5)

    # --- CE-only path (teacher softmax statically skipped) ---
    out2 = model.forward(input_ids, attention_mask, labels=labels,
                         ce_mask=ce_mask, use_distillation=False)
    jax.block_until_ready(out2["loss"])
    assert jnp.allclose(out2["loss"], out["ce_loss"], atol=1e-6, rtol=1e-6)
    assert jnp.allclose(out2["distillation_loss"], 0.0)

    # --- encode-only path ---
    enc = model.encode(input_ids, attention_mask)
    jax.block_until_ready(enc)
    assert jnp.allclose(enc, ref_logits, atol=1e-4, rtol=1e-4)

    # --- multi-block grid + partial last block (B not a multiple of TB) ---
    B2 = 10
    model2 = EediRankerPallas(vocab_size=V, hidden=H, num_labels=L,
                              key=k_model, tb=8)
    ki, kl, kt, km = jax.random.split(jax.random.PRNGKey(1), 4)
    ids2 = jax.random.randint(ki, (B2, S), 0, V, dtype=jnp.int32)
    lab2 = jax.random.randint(kl, (B2,), 0, L, dtype=jnp.int32)
    teach2 = jax.random.normal(kt, (B2, L), jnp.float32)
    mask2 = (jax.random.uniform(km, (B2,)) > 0.3).astype(jnp.float32)
    out3 = model2.forward(ids2, jnp.ones((B2, S), jnp.int32), labels=lab2,
                          teacher_logits=teach2, ce_mask=mask2,
                          temperature=temperature, use_distillation=True)
    jax.block_until_ready(out3["loss"])
    h2 = model2.embed[ids2[:, -1]]
    ref_logits2 = jnp.dot(h2.astype(model2.w_letters.dtype), model2.w_letters,
                          preferred_element_type=jnp.float32)
    assert jnp.allclose(out3["logits"], ref_logits2, atol=1e-4, rtol=1e-4)
    ref_ce2, ref_dist2 = _reference_losses(out3["logits"], lab2, mask2,
                                           teach2, temperature)
    assert jnp.allclose(out3["ce_loss"], ref_ce2, atol=1e-5, rtol=1e-5)
    assert jnp.allclose(out3["distillation_loss"], ref_dist2, atol=1e-5,
                        rtol=1e-5)

    print("KERNEL_OK")
</pallas_src>

<mosaic_0001>
module attributes {stable_mosaic.version = 11 : i64} {
  func.func @_ranker_kernel(%arg0: i32, %arg1: memref<8xi32, #tpu.memory_space<smem>>, %arg2: memref<1x1xf32, #tpu.memory_space<vmem>>, %arg3: memref<256x32xf32, #tpu.memory_space<any>>, %arg4: memref<32x4xbf16, #tpu.memory_space<vmem>>, %arg5: memref<8x1xi32, #tpu.memory_space<vmem>>, %arg6: memref<8x1xf32, #tpu.memory_space<vmem>>, %arg7: memref<8x4xf32, #tpu.memory_space<vmem>>, %arg8: memref<8x4xf32, #tpu.memory_space<vmem>>, %arg9: memref<1x8x128xf32, #tpu.memory_space<vmem>>, %arg10: memref<8x32xf32, #tpu.memory_space<vmem>>, %arg11: memref<8x!tpu.dma_semaphore, #tpu.memory_space<semaphore_mem>>) attributes {dimension_semantics = [#tpu.dimension_semantics<parallel>], iteration_bounds = array<i64: 1>, scalar_prefetch = 1 : i64, scratch_operands = 2 : i64, tpu.core_type = #tpu.core_type<tc>, window_params = [{pipeline_mode = #tpu.pipeline_mode<synchronous>, transform_indices = @transform_0, window_bounds = array<i64: 1, 1>}, {}, {pipeline_mode = #tpu.pipeline_mode<synchronous>, transform_indices = @transform_2, window_bounds = array<i64: 32, 4>}, {transform_indices = @transform_3, window_bounds = array<i64: 8, 1>}, {transform_indices = @transform_4, window_bounds = array<i64: 8, 1>}, {transform_indices = @transform_5, window_bounds = array<i64: 8, 4>}, {transform_indices = @transform_6, window_bounds = array<i64: 8, 4>}, {transform_indices = @transform_7, window_bounds = array<i64: 1, 8, 128>}]} {
    %c8_i32 = arith.constant 8 : i32
    %0 = arith.muli %arg0, %c8_i32 : i32
    %c0_i32 = arith.constant 0 : i32
    %c8_i32_0 = arith.constant 8 : i32
    %1 = arith.addi %c0_i32, %c8_i32_0 : i32
    %c1_i32 = arith.constant 1 : i32
    scf.for %arg12 = %c0_i32 to %1 step %c1_i32  : i32 {
      %c1_i32_35 = arith.constant 1 : i32
      %77 = arith.muli %arg12, %c1_i32_35 : i32
      %c0_i32_36 = arith.constant 0 : i32
      %78 = arith.addi %c0_i32_36, %77 : i32
      %79 = arith.addi %0, %78 : i32
      %80 = arith.index_cast %79 : i32 to index
      %81 = memref.load %arg1[%80] : memref<8xi32, #tpu.memory_space<smem>>
      %c0_i32_37 = arith.constant 0 : i32
      %82 = tpu.memref_slice %arg3[%81, %c0_i32_37] : memref<256x32xf32, #tpu.memory_space<any>> -> memref<1x32xf32, #tpu.memory_space<any>>
      %c0_i32_38 = arith.constant 0 : i32
      %83 = tpu.memref_slice %arg10[%78, %c0_i32_38] : memref<8x32xf32, #tpu.memory_space<vmem>> -> memref<1x32xf32, #tpu.memory_space<vmem>>
      %84 = tpu.memref_slice %arg11[%78] : memref<8x!tpu.dma_semaphore, #tpu.memory_space<semaphore_mem>> -> memref<1x!tpu.dma_semaphore, #tpu.memory_space<semaphore_mem>>
      %85 = tpu.memref_squeeze %84 : memref<1x!tpu.dma_semaphore, #tpu.memory_space<semaphore_mem>> -> memref<!tpu.dma_semaphore, #tpu.memory_space<semaphore_mem>>
      tpu.enqueue_dma source(%82 : memref<1x32xf32, #tpu.memory_space<any>>) target(%83 : memref<1x32xf32, #tpu.memory_space<vmem>>) target_semaphore(%85 : memref<!tpu.dma_semaphore, #tpu.memory_space<semaphore_mem>>)
    }
    %c8_i32_1 = arith.constant 8 : i32
    %c0_i32_2 = arith.constant 0 : i32
    %c8_i32_3 = arith.constant 8 : i32
    %2 = arith.addi %c0_i32_2, %c8_i32_3 : i32
    %c1_i32_4 = arith.constant 1 : i32
    scf.for %arg12 = %c0_i32_2 to %2 step %c1_i32_4  : i32 {
      %c1_i32_35 = arith.constant 1 : i32
      %77 = arith.muli %arg12, %c1_i32_35 : i32
      %c0_i32_36 = arith.constant 0 : i32
      %78 = arith.addi %c0_i32_36, %77 : i32
      %79 = arith.addi %0, %78 : i32
      %80 = arith.index_cast %79 : i32 to index
      %81 = memref.load %arg1[%80] : memref<8xi32, #tpu.memory_space<smem>>
      %c0_i32_37 = arith.constant 0 : i32
      %82 = tpu.memref_slice %arg3[%81, %c0_i32_37] : memref<256x32xf32, #tpu.memory_space<any>> -> memref<1x32xf32, #tpu.memory_space<any>>
      %c0_i32_38 = arith.constant 0 : i32
      %83 = tpu.memref_slice %arg10[%78, %c0_i32_38] : memref<8x32xf32, #tpu.memory_space<vmem>> -> memref<1x32xf32, #tpu.memory_space<vmem>>
      %84 = tpu.memref_slice %arg11[%78] : memref<8x!tpu.dma_semaphore, #tpu.memory_space<semaphore_mem>> -> memref<1x!tpu.dma_semaphore, #tpu.memory_space<semaphore_mem>>
      %85 = tpu.memref_squeeze %84 : memref<1x!tpu.dma_semaphore, #tpu.memory_space<semaphore_mem>> -> memref<!tpu.dma_semaphore, #tpu.memory_space<semaphore_mem>>
      tpu.wait_dma2 semaphore(%85 : memref<!tpu.dma_semaphore, #tpu.memory_space<semaphore_mem>>) src(%82 : memref<1x32xf32, #tpu.memory_space<any>>) dst(%83 : memref<1x32xf32, #tpu.memory_space<vmem>>)
    }
    %c8_i32_5 = arith.constant 8 : i32
    %c0 = arith.constant 0 : index
    %c0_6 = arith.constant 0 : index
    %3 = vector.load %arg10[%c0, %c0_6] : memref<8x32xf32, #tpu.memory_space<vmem>>, vector<8x32xf32>
    %4 = arith.truncf %3 : vector<8x32xf32> to vector<8x32xbf16>
    %c0_7 = arith.constant 0 : index
    %c0_8 = arith.constant 0 : index
    %5 = vector.load %arg4[%c0_7, %c0_8] : memref<32x4xbf16, #tpu.memory_space<vmem>>, vector<32x4xbf16>
    %cst = arith.constant dense<0.000000e+00> : vector<8x4xf32>
    %6 = tpu.matmul %4, %5, %cst {dimension_numbers = #tpu.dot_dimension_numbers<[1], [0], [0], [1], [0, 0, 1, 1], [], []>} : vector<8x32xbf16>, vector<32x4xbf16>, vector<8x4xf32> -> vector<8x4xf32>
    %c0_9 = arith.constant 0 : index
    %c0_10 = arith.constant 0 : index
    %7 = vector.load %arg8[%c0_9, %c0_10] : memref<8x4xf32, #tpu.memory_space<vmem>>, vector<8x4xf32>
    tpu.vector_store %arg8[%c0_9, %c0_10], %6 {strides = array<i32>} : memref<8x4xf32, #tpu.memory_space<vmem>>, vector<8x4xf32>,
    %8 = tpu.iota {dimensions = array<i32: 0>} : vector<8x1xi32>
    %9 = vector.broadcast %0 : i32 to vector<8x1xi32>
    %10 = arith.addi %9, %8 : vector<8x1xi32>
    %c2_i32 = arith.constant 2 : i32
    %11 = vector.broadcast %c2_i32 : i32 to vector<8x1xi32>
    %12 = arith.cmpi slt, %10, %11 : vector<8x1xi32>
    %13 = arith.extui %12 : vector<8x1xi1> to vector<8x1xi32>
    %14 = arith.sitofp %13 : vector<8x1xi32> to vector<8x1xf32>
    %cst_11 = arith.constant dense<0xFF800000> : vector<8xf32>
    %15 = vector.multi_reduction <maximumf>, %6, %cst_11 [1] : vector<8x4xf32> to vector<8xf32>
    %16 = vector.shape_cast %15 : vector<8xf32> to vector<8x1xf32>
    %17 = vector.broadcast %16 : vector<8x1xf32> to vector<8x4xf32>
    %18 = arith.subf %6, %17 : vector<8x4xf32>
    %19 = math.exp %18 : vector<8x4xf32>
    %cst_12 = arith.constant dense<0.000000e+00> : vector<8xf32>
    %20 = vector.multi_reduction <add>, %19, %cst_12 [1] : vector<8x4xf32> to vector<8xf32>
    %21 = vector.shape_cast %20 : vector<8xf32> to vector<8x1xf32>
    %22 = math.log %21 : vector<8x1xf32>
    %23 = vector.broadcast %22 : vector<8x1xf32> to vector<8x4xf32>
    %24 = arith.subf %18, %23 : vector<8x4xf32>
    %25 = tpu.iota {dimensions = array<i32: 1>} : vector<8x4xi32>
    %c0_13 = arith.constant 0 : index
    %c0_14 = arith.constant 0 : index
    %26 = vector.load %arg5[%c0_13, %c0_14] : memref<8x1xi32, #tpu.memory_space<vmem>>, vector<8x1xi32>
    %27 = vector.broadcast %26 : vector<8x1xi32> to vector<8x4xi32>
    %28 = arith.cmpi eq, %25, %27 : vector<8x4xi32>
    %29 = arith.extui %28 : vector<8x4xi1> to vector<8x4xi32>
    %30 = arith.sitofp %29 : vector<8x4xi32> to vector<8x4xf32>
    %31 = arith.mulf %30, %24 : vector<8x4xf32>
    %cst_15 = arith.constant dense<0.000000e+00> : vector<8xf32>
    %32 = vector.multi_reduction <add>, %31, %cst_15 [1] : vector<8x4xf32> to vector<8xf32>
    %33 = vector.shape_cast %32 : vector<8xf32> to vector<8x1xf32>
    %cst_16 = arith.constant 0.000000e+00 : f32
    %34 = vector.broadcast %cst_16 : f32 to vector<8x1xf32>
    %35 = arith.subf %34, %33 : vector<8x1xf32>
    %c0_17 = arith.constant 0 : index
    %c0_18 = arith.constant 0 : index
    %36 = vector.load %arg6[%c0_17, %c0_18] : memref<8x1xf32, #tpu.memory_space<vmem>>, vector<8x1xf32>
    %37 = arith.mulf %35, %36 : vector<8x1xf32>
    %38 = arith.mulf %37, %14 : vector<8x1xf32>
    %cst_19 = arith.constant dense<0.000000e+00> : vector<1xf32>
    %39 = vector.multi_reduction <add>, %38, %cst_19 [0] : vector<8x1xf32> to vector<1xf32>
    %40 = vector.shape_cast %39 : vector<1xf32> to vector<1x1xf32>
    %c0_20 = arith.constant 0 : index
    %c0_21 = arith.constant 0 : index
    %41 = vector.load %arg7[%c0_20, %c0_21] : memref<8x4xf32, #tpu.memory_space<vmem>>, vector<8x4xf32>
    %c0_22 = arith.constant 0 : index
    %c0_23 = arith.constant 0 : index
    %42 = vector.load %arg2[%c0_22, %c0_23] : memref<1x1xf32, #tpu.memory_space<vmem>>, vector<1x1xf32>
    %43 = vector.broadcast %42 : vector<1x1xf32> to vector<8x4xf32>
    %44 = arith.mulf %41, %43 : vector<8x4xf32>
    %cst_24 = arith.constant dense<0xFF800000> : vector<8xf32>
    %45 = vector.multi_reduction <maximumf>, %44, %cst_24 [1] : vector<8x4xf32> to vector<8xf32>
    %46 = vector.shape_cast %45 : vector<8xf32> to vector<8x1xf32>
    %47 = vector.broadcast %46 : vector<8x1xf32> to vector<8x4xf32>
    %48 = arith.subf %44, %47 : vector<8x4xf32>
    %49 = math.exp %48 : vector<8x4xf32>
    %cst_25 = arith.constant dense<0.000000e+00> : vector<8xf32>
    %50 = vector.multi_reduction <add>, %49, %cst_25 [1] : vector<8x4xf32> to vector<8xf32>
    %51 = vector.shape_cast %50 : vector<8xf32> to vector<8x1xf32>
    %52 = vector.broadcast %51 : vector<8x1xf32> to vector<8x4xf32>
    %53 = arith.divf %49, %52 : vector<8x4xf32>
    %54 = arith.mulf %24, %53 : vector<8x4xf32>
    %cst_26 = arith.constant dense<0.000000e+00> : vector<8xf32>
    %55 = vector.multi_reduction <add>, %54, %cst_26 [1] : vector<8x4xf32> to vector<8xf32>
    %56 = vector.shape_cast %55 : vector<8xf32> to vector<8x1xf32>
    %57 = arith.mulf %56, %14 : vector<8x1xf32>
    %cst_27 = arith.constant dense<0.000000e+00> : vector<1xf32>
    %58 = vector.multi_reduction <add>, %57, %cst_27 [0] : vector<8x1xf32> to vector<1xf32>
    %59 = vector.shape_cast %58 : vector<1xf32> to vector<1x1xf32>
    %cst_28 = arith.constant 0.000000e+00 : f32
    %60 = vector.broadcast %cst_28 : f32 to vector<1x1xf32>
    %61 = arith.subf %60, %59 : vector<1x1xf32>
    %62 = tpu.iota {dimensions = array<i32: 2>} : vector<1x8x128xi32>
    %c0_i32_29 = arith.constant 0 : i32
    %63 = vector.broadcast %c0_i32_29 : i32 to vector<1x8x128xi32>
    %64 = arith.cmpi eq, %62, %63 : vector<1x8x128xi32>
    %65 = vector.shape_cast %40 : vector<1x1xf32> to vector<1x1x1xf32>
    %c1_i32_30 = arith.constant 1 : i32
    %66 = vector.broadcast %c1_i32_30 : i32 to vector<1x8x128xi32>
    %67 = arith.cmpi eq, %62, %66 : vector<1x8x128xi32>
    %68 = vector.shape_cast %61 : vector<1x1xf32> to vector<1x1x1xf32>
    %cst_31 = arith.constant 0.000000e+00 : f32
    %69 = vector.shape_cast %68 : vector<1x1x1xf32> to vector<1x1x1xf32>
    %70 = vector.broadcast %69 : vector<1x1x1xf32> to vector<1x8x128xf32>
    %71 = vector.broadcast %cst_31 : f32 to vector<1x8x128xf32>
    %72 = arith.select %67, %70, %71 : vector<1x8x128xi1>, vector<1x8x128xf32>
    %73 = vector.shape_cast %65 : vector<1x1x1xf32> to vector<1x1x1xf32>
    %74 = vector.broadcast %73 : vector<1x1x1xf32> to vector<1x8x128xf32>
    %75 = arith.select %64, %74, %72 : vector<1x8x128xi1>, vector<1x8x128xf32>
    %c0_32 = arith.constant 0 : index
    %c0_33 = arith.constant 0 : index
    %c0_34 = arith.constant 0 : index
    %76 = vector.load %arg9[%c0_32, %c0_33, %c0_34] : memref<1x8x128xf32, #tpu.memory_space<vmem>>, vector<1x8x128xf32>
    tpu.vector_store %arg9[%c0_32, %c0_33, %c0_34], %75 {strides = array<i32>} : memref<1x8x128xf32, #tpu.memory_space<vmem>>, vector<1x8x128xf32>,
    return
  }
  func.func @transform_0(%arg0: i32, %arg1: memref<8xi32, #tpu.memory_space<smem>>) -> (i32, i32) {
    %c0_i32 = arith.constant 0 : i32
    %c0_i32_0 = arith.constant 0 : i32
    %c0_i32_1 = arith.constant 0 : i32
    return %c0_i32, %c0_i32_0 : i32, i32
  }
  func.func @transform_2(%arg0: i32, %arg1: memref<8xi32, #tpu.memory_space<smem>>) -> (i32, i32) {
    %c0_i32 = arith.constant 0 : i32
    %c0_i32_0 = arith.constant 0 : i32
    %c0_i32_1 = arith.constant 0 : i32
    return %c0_i32, %c0_i32_0 : i32, i32
  }
  func.func @transform_3(%arg0: i32, %arg1: memref<8xi32, #tpu.memory_space<smem>>) -> (i32, i32) {
    %c0_i32 = arith.constant 0 : i32
    %c0_i32_0 = arith.constant 0 : i32
    return %arg0, %c0_i32 : i32, i32
  }
  func.func @transform_4(%arg0: i32, %arg1: memref<8xi32, #tpu.memory_space<smem>>) -> (i32, i32) {
    %c0_i32 = arith.constant 0 : i32
    %c0_i32_0 = arith.constant 0 : i32
    return %arg0, %c0_i32 : i32, i32
  }
  func.func @transform_5(%arg0: i32, %arg1: memref<8xi32, #tpu.memory_space<smem>>) -> (i32, i32) {
    %c0_i32 = arith.constant 0 : i32
    %c0_i32_0 = arith.constant 0 : i32
    return %arg0, %c0_i32 : i32, i32
  }
  func.func @transform_6(%arg0: i32, %arg1: memref<8xi32, #tpu.memory_space<smem>>) -> (i32, i32) {
    %c0_i32 = arith.constant 0 : i32
    %c0_i32_0 = arith.constant 0 : i32
    return %arg0, %c0_i32 : i32, i32
  }
  func.func @transform_7(%arg0: i32, %arg1: memref<8xi32, #tpu.memory_space<smem>>) -> (i32, i32, i32) {
    %c0_i32 = arith.constant 0 : i32
    %c0_i32_0 = arith.constant 0 : i32
    %c0_i32_1 = arith.constant 0 : i32
    return %arg0, %c0_i32, %c0_i32_0 : i32, i32, i32
  }
}

</mosaic_0001>

<bundles_post_ra>
// kernel: tpu_custom_call.1
= control target key start
LH: loop header
LB: loop body
LE: loop exit
PB: predicated region body
PF: predicated region fallthrough
CT: control target
= control target key end

     0   :  { %s567_s0 = inlined_call_operand.vmem [shape: s32[8], index: 0, kind: input, shape index: {}]   ;;  %s568_s2 = inlined_call_operand.vmem [shape: f32[256,32], index: 2, kind: input, shape index: {}]   ;;  %s569_s3 = inlined_call_operand.vmem [shape: bf16[32,4], index: 3, kind: input, shape index: {}]   ;;  %s570_s4 = inlined_call_operand.vmem [shape: s32[8,1], index: 4, kind: input, shape index: {}]   ;;  %s571_s5 = inlined_call_operand.vmem [shape: f32[8,1], index: 5, kind: input, shape index: {}]   ;;  %s572_s6 = inlined_call_operand.vmem [shape: f32[8,4], index: 6, kind: input, shape index: {}]   ;;  %s573_s7 = inlined_call_operand.vmem [shape: f32[8,4], index: 7, kind: output, shape index: {0}]   ;;  %s574_s8 = inlined_call_operand.hbm [shape: f32[1,8,128], index: 8, kind: output, shape index: {1}]   ;;  %s575_s1 = inlined_call_operand.<no memory space> [shape: f32[1,1], index: 1, kind: input, shape index: {}]  }
   0x1   :  { %s14_s29 = sshll.u32 %s567_s0, 4  ;;  %v18_v0 = vstv %s575_s1  ;;  %s15_s29 = int_to_ptr.vmem [resolvable:$true] %s14_s29 }
   0x2   :  { %19 = vst [vmem:[#allocation6] sm:$0x1] %v18_v0  ;;  %s410_s10 = scalar_lea.vmem %s15_s29, 16  ;;  %p415_p1 = scmp.lt.s32.totalorder %s15_s29, %s15_s29 }
   0x3   :  { %p411_p0 = scmp.ne.s32.totalorder %s15_s29, %s410_s10  ;;  %p416_p2 = scmp.lt.s32.totalorder %s410_s10, %s410_s10 }
   0x5   :  { %p417_p3 = por %p416_p2, %p415_p1 }
   0x7   :  { %p418_p4 = pnand %p417_p3, %p411_p0 }
   0x9   :  { %421 = shalt.err (!%p418_p4)  }
   0xa   :  { %s466_s11 = smov [#allocation5]  }
   0xb   :  { %17 = dma.vmem_to_smem %s15_s29, 16, %s466_s11, [#allocation4] }
   0xc   :  { %452 = dma.done.wait [#allocation4], 16 }
   0xd   :  { %453 = vsyncadd [#allocation4], 4294967280 }
   0xe   :  { %21 = sfence }
   0xf   :  { %22 = vsyncpa [#allocation8], 0  ;;  %s458_s0 = smov 0  }
  0x10 LB: > { %s42_s1 = sld [smem:[#allocation5 + %s460_s0]]  ;;  %s44_s15 = scalar_lea.vmem [#allocation2], %s460_s0  ;;  %s460_s0 = sphi %s458_s0, %s40_s0  }
  0x11   : > { %s45_s16 = scalar_lea.sflag [#allocation3], %s460_s0 }
  0x16   : > { %s43_s14 = scalar_lea.vmem %s568_s2, %s42_s1 }
  0x17   : > { %v63_v1 = vld [vmem:[%s43_s14] sm:$0x1] }
  0x18   : > { %64 = vst [vmem:[%s44_s15] sm:$0x1] %v63_v1 }
  0x19   : > { %89 = vsyncadd %s45_s16, 16  ;;  %s40_s0 = sadd.s32 1, %s460_s0  }
  0x1a   : > { %p37_p5 = scmp.ge.s32.totalorder %s40_s0, 8  }
  0x1b   :  { %s462_s17 = smov (%p37_p5), 0  }
  0x1c   :  { %39 = sbr.rel (!%p37_p5) target bundleno = 16 (0x10), region = 113 }
  0x23 LB: > { %s98_s18 = scalar_lea.sflag [#allocation3], %s464_s17  ;;  %s464_s17 = sphi %s462_s17, %s95_s17  }
  0x24   : > { %454 = dma.done.wait %s98_s18, 16 }
  0x25   : > { %455 = vsyncadd %s98_s18, 4294967280  ;;  %s95_s17 = sadd.s32 1, %s464_s17  }
  0x26   : > { %p92_p6 = scmp.ge.s32.totalorder %s95_s17, 8  }
  0x27   :  { %v400_v2 = vld [vmem:[%s569_s3] sm:$0xff] (%p92_p6)   ;;  %v467_v3 = vmov (%p92_p6), 0.0   ;;  %v401_v4 = vld [vmem:[%s569_s3 + $0x8] sm:$0xff] (%p92_p6)   ;;  %vm468_vm0 = vmmov (%p92_p6), 0   ;;  %vm120_vm1 = vcmask (%p92_p6), 261120   ;;  %v469_v7 = vmov (%p92_p6), 0  }
  0x28   :  { %94 = sbr.rel (!%p92_p6) target bundleno = 35 (0x23), region = 124  ;;  %369 = vmatprep.subr.bf16.mxu0 (%p92_p6), %v467_v3  ;;  %373 = vmatprep.mubr.msk.bf16.mxu0 (%p92_p6), %vm468_vm0, %v467_v3  ;;  %v102_v5 = vld [vmem:[#allocation2] sm:$0xff] (%p92_p6)  ;;  %vm164_vm2 = vcmask (%p92_p6), 31744   ;;  %v357_v13 = vld [vmem:[#allocation6] ss:$0 sm:$0xff] (%p92_p6)  ;;  %v166_v28 = vlaneseq (%p92_p6)  ;;  %vm202_vm5 = vcmask (%p92_p6), 7168  }
  0x29   :  { %370 = vmatpush3.bf16.msra.mxu0 (%p92_p6), %v400_v2  ;;  %v103_v6 = vpack.c.bf16 (%p92_p6), %v102_v5, %v102_v5  ;;  %398 = vset.pattern.permute.xlu0 (%p92_p6), %v469_v7  ;;  %v210_v17 = vld [vmem:[%s572_s6] sm:$0xff] (%p92_p6) }
  0x2a   :  { %371 = vmatprep.subr.bf16.mxu0 (%p92_p6), %v467_v3  ;;  %399 = vset.pattern.permute.xlu1 (%p92_p6), %v469_v7  ;;  %v187_v23 = vld [vmem:[%s570_s4] sm:$0xff] (%p92_p6)  ;;  %v186_v29 = vand.u32 (%p92_p6), 127, %v166_v28  ;;  %v167_v40 = vshrl.u32 (%p92_p6), %v166_v28, 7 }
  0x2b   :  { %v199_v41 = vld [vmem:[%s571_s5] sm:$0xff] (%p92_p6)  ;;  %s470_s5 = smov (%p92_p6), [#allocation7]  }
  0x2c   :  { %vm170_vm4 = vcmp.lt.s32.totalorder (%p92_p6), %v167_v40, 2  ;;  %vm246_vm6 = vcmp.eq.s32.totalorder (%p92_p6), %v186_v29, 1  ;;  %s263_s26 = sshll.u32 (%p92_p6), %s470_s5, 4  ;;  %vm245_vm7 = vcmp.eq.s32.totalorder (%p92_p6), %v186_v29, 0  ;;  %s264_s26 = int_to_ptr.vmem [resolvable:$true] %s263_s26 }
  0x2d   :  { %372 = vmatpush3.bf16.msra.mxu0 (%p92_p6), %v401_v4  ;;  %v355_v44 = vsel (%p92_p6), %vm170_vm4, 1.0, %v467_v3  ;;  %s422_s27 = scalar_lea.vmem (%p92_p6), %s264_s26, 128  ;;  %p427_p8 = scmp.lt.s32.totalorder (%p92_p6), %s264_s26, %s264_s26 }
  0x2e   :  { %p423_p7 = scmp.ne.s32.totalorder (%p92_p6), %s264_s26, %s422_s27  ;;  %p428_p9 = scmp.lt.s32.totalorder (%p92_p6), %s422_s27, %s422_s27 }
  0x30   :  { %374 = vmatmul.mubr.msk.bf16.vlgmr.msra.gmra.mrb[0].mxu0 %vm120_vm1, %v103_v6  ;;  %p429_p10 = por %p428_p9, %p427_p8 }
  0x32   :  { %p430_p11 = pnand %p429_p10, %p423_p7 }
 0x103   :  { %v158_v8 = vpop.f32.mrb[0].mxu0 }
 0x104   :  { %165 = vst.msk [vmem:[%s573_s7] sm:$0xff] %vm164_vm2, %v158_v8  ;;  %v375_v9 = vpop.f32.mrb[1].mxu0  ;;  %v173_v10 = vsel %vm164_vm2, %v158_v8, -inf }
 0x105   :  { %174 = vmax.xlane.f32.xlu0 %v173_v10  ;;  %v161_v11 = vpop.f32.mrb[2].mxu0 }
 0x106   :  { %v376_v12 = vpop.f32.mrb[3].mxu0 }
 0x11b   :  { %218 = vperm.xlu0 %398, %v357_v13  }
 0x192   :  { %v175_v14 = vpop.xlane.xlu0 %174 }
 0x193   :  { %v176_v15 = vsub.f32 %v158_v8, %v175_v14 }
 0x195   :  { %v177_v16 = vmul.f32 1.442695, %v176_v15 }
 0x197   :  { %402 = vpow2.f32 %v177_v16 }
 0x19a   :  { %v219_v18 = vpop.permute.xlu0 %218 }
 0x19b   :  { %v221_v19 = vmul.f32 %v219_v18, %v210_v17 }
 0x19d   :  { %v222_v20 = vsel %vm164_vm2, %v221_v19, -inf }
 0x19e   :  { %223 = vmax.xlane.f32.xlu1 %v222_v20 }
 0x1a1   :  { %v403_v21 = vpop.eup %402 }
 0x1a2   :  { %v179_v22 = vsel %vm164_vm2, %v403_v21, 0.0 }
 0x1a3   :  { %180 = vadd.xlane.f32.xlu1 %v179_v22 }
 0x1b4   :  { %189 = vperm.xlu1 %399, %v187_v23  }
 0x22b   :  { %v224_v24 = vpop.xlane.xlu1 %223 }
 0x22c   :  { %v225_v25 = vsub.f32 %v221_v19, %v224_v24 }
 0x22e   :  { %v226_v26 = vmul.f32 1.442695, %v225_v25 }
 0x230   :  { %404 = vpow2.f32 %v226_v26  ;;  %v181_v27 = vpop.xlane.xlu1 %180 }
 0x231   :  { %406 = vlog2.f32 %v181_v27 }
 0x234   :  { %v190_v30 = vpop.permute.xlu1 %189 }
 0x235   :  { %vm191_vm3 = vcmp.eq.s32.totalorder %v186_v29, %v190_v30 }
 0x236   :  { %v356_v35 = vsel %vm191_vm3, 1.0, %v467_v3 }
 0x23a   :  { %v405_v31 = vpop.eup %404 }
 0x23b   :  { %v407_v32 = vpop.eup %406  ;;  %v228_v33 = vsel %vm164_vm2, %v405_v31, 0.0 }
 0x23c   :  { %v183_v34 = vmul.f32 0.6931472, %v407_v32  ;;  %229 = vadd.xlane.f32.xlu1 %v228_v33 }
 0x23e   :  { %v184_v36 = vsub.f32 %v176_v15, %v183_v34 }
 0x240   :  { %v194_v37 = vmul.f32 %v356_v35, %v184_v36 }
 0x242   :  { %v195_v38 = vsel %vm164_vm2, %v194_v37, 0.0 }
 0x243   :  { %196 = vadd.xlane.f32.xlu0 %v195_v38 }
 0x2c9   :  { %v230_v39 = vpop.xlane.xlu1 %229 }
 0x2ca   :  { %408 = vrcp.f32 %v230_v39 }
 0x2d0   :  { %v197_v42 = vpop.xlane.xlu0 %196 }
 0x2d1   :  { %v198_v43 = vsub.f32 0.0, %v197_v42 }
 0x2d3   :  { %v200_v45 = vmul.f32 %v199_v41, %v198_v43 }
 0x2d4   :  { %v409_v46 = vpop.eup %408 }
 0x2d5   :  { %v201_v47 = vmul.f32 %v355_v44, %v200_v45  ;;  %v232_v48 = vmul.f32 %v409_v46, %v405_v31 }
 0x2d7   :  { %v203_v49 = vsel %vm202_vm5, %v201_v47, 0.0  ;;  %v233_v50 = vmul.f32 %v232_v48, %v184_v36 }
 0x2d8   :  { %v204_v51 = vrot.slane %v203_v49, 4 }
 0x2d9   :  { %v234_v52 = vsel %vm164_vm2, %v233_v50, 0.0 }
 0x2da   :  { %v205_v53 = vadd.f32 %v204_v51, %v203_v49  ;;  %235 = vadd.xlane.f32.xlu1 %v234_v52 }
 0x2dc   :  { %v206_v54 = vrot.slane %v205_v53, 2 }
 0x2de   :  { %v207_v55 = vadd.f32 %v206_v54, %v205_v53 }
 0x2e0   :  { %v208_v56 = vrot.slane %v207_v55, 1 }
 0x2e2   :  { %v209_v57 = vadd.f32 %v208_v56, %v207_v55 }
 0x2eb   :  { %250 = vperm.xlu1 %399, %v209_v57  }
 0x367   :  { %v236_v58 = vpop.xlane.xlu1 %235 }
 0x368   :  { %v237_v59 = vmul.f32 %v355_v44, %v236_v58 }
 0x36a   :  { %v238_v60 = vrot.slane %v237_v59, 4 }
 0x36b   :  { %v251_v3 = vpop.permute.xlu1 %250 }
 0x36c   :  { %v239_v61 = vadd.f32 %v238_v60, %v237_v59 }
 0x36e   :  { %v240_v62 = vrot.slane %v239_v61, 2 }
 0x370   :  { %v241_v63 = vadd.f32 %v240_v62, %v239_v61 }
 0x372   :  { %v242_v0 = vrot.slane %v241_v63, 1 }
 0x374   :  { %v243_v1 = vadd.f32 %v242_v0, %v241_v63 }
 0x376   :  { %v244_v2 = vsub.f32 0.0, %v243_v1 }
 0x378   :  { %v247_v4 = vsel %vm246_vm6, %v244_v2, 0.0 }
 0x379   :  { %v253_v5 = vsel %vm245_vm7, %v251_v3, %v247_v4 }
 0x37a   :  { %254 = vst [vmem:[#allocation7] sm:$0xff] %v253_v5 }
 0x37b   :  { %433 = shalt.err (!%p430_p11)
}
 0x37c   :  { %s434_s30 = scalar_lea.hbm %s574_s8, 128 }
 0x37d   :  { %p435_p12 = scmp.ne.s32.totalorder %s574_s8, %s434_s30  ;;  %p438_p13 = scmp.lt.u32.totalorder %s434_s30, %s574_s8 }
 0x37f   :  { %p440_p0 = pnand %p438_p13, %p435_p12 }
 0x381   :  { %443 = shalt.err (!%p440_p0)
}
 0x382   :  { %266 = dma.vmem_to_hbm [thread:$0]  %s264_s26, 128, %s574_s8, [#allocation8]  }
 0x383   :  { %456 = dma.done.wait [#allocation8], 128  }
 0x384   :  { %457 = vsyncadd [#allocation8], 4294967168 }
 0x385   :  { %272 = vsyncpa [#allocation8], 1 }
 0x386   :  { %273 = vsyncmov [#allocation3] }
 0x389   :  { %s274_s13 = vpop.sfrf %273 }
 0x38a   :  { %p358_p1 = scmp.ne.s32.totalorder %s274_s13, 0 }
 0x38c   :  { %278 = shalt.err (%p358_p1)  }
 0x38d   :  { %280 = vsyncmov [#allocation3 + $0x1] }
 0x390   :  { %s281_s14 = vpop.sfrf %280 }
 0x391   :  { %p359_p2 = scmp.ne.s32.totalorder %s281_s14, 0 }
 0x393   :  { %285 = shalt.err (%p359_p2)  }
 0x394   :  { %287 = vsyncmov [#allocation3 + $0x2] }
 0x397   :  { %s288_s15 = vpop.sfrf %287 }
 0x398   :  { %p360_p3 = scmp.ne.s32.totalorder %s288_s15, 0 }
 0x39a   :  { %292 = shalt.err (%p360_p3)  }
 0x39b   :  { %294 = vsyncmov [#allocation3 + $0x3] }
 0x39e   :  { %s295_s16 = vpop.sfrf %294 }
 0x39f   :  { %p361_p4 = scmp.ne.s32.totalorder %s295_s16, 0 }
 0x3a1   :  { %299 = shalt.err (%p361_p4)  }
 0x3a2   :  { %301 = vsyncmov [#allocation3 + $0x4] }
 0x3a5   :  { %s302_s8 = vpop.sfrf %301 }
 0x3a6   :  { %p362_p5 = scmp.ne.s32.totalorder %s302_s8, 0 }
 0x3a8   :  { %306 = shalt.err (%p362_p5)  }
 0x3a9   :  { %308 = vsyncmov [#allocation3 + $0x5] }
 0x3ac   :  { %s309_s17 = vpop.sfrf %308 }
 0x3ad   :  { %p363_p6 = scmp.ne.s32.totalorder %s309_s17, 0 }
 0x3af   :  { %313 = shalt.err (%p363_p6)  }
 0x3b0   :  { %315 = vsyncmov [#allocation3 + $0x6] }
 0x3b3   :  { %s316_s18 = vpop.sfrf %315 }
 0x3b4   :  { %p364_p7 = scmp.ne.s32.totalorder %s316_s18, 0 }
 0x3b6   :  { %320 = shalt.err (%p364_p7)  }
 0x3b7   :  { %322 = vsyncmov [#allocation3 + $0x7] }
 0x3ba   :  { %s323_s19 = vpop.sfrf %322 }
 0x3bb   :  { %p365_p8 = scmp.ne.s32.totalorder %s323_s19, 0 }
 0x3bd   :  { %327 = shalt.err (%p365_p8)  }

</bundles_post_ra>
